<compile_context>
chip_gen: v7x
topology: tpu7x:2x2x1
jax: 0.10.0
libtpu: 0.0.40
codegen_flags: <defaults>
</compile_context>

<pallas_src>
import functools

import jax
import jax.numpy as jnp
from jax.experimental import pallas as pl
from jax.experimental.pallas import tpu as pltpu

_PAD_NEG = -1e30  # finite; exp() underflows to 0, keeps all math NaN-free


def _round_up(x, m):
    return (x + m - 1) // m * m


def _kd_kernel(x_ref, t_ref, part_ref, *, inv_temp):
    # Tiles are (block_n, c_pad), classes on the lane axis.
    z1 = x_ref[...].astype(jnp.float32) * inv_temp   # student logits / T
    z2 = t_ref[...].astype(jnp.float32) * inv_temp   # teacher logits / T

    # log_softmax(z1) along classes (numerically stable).
    m1 = jnp.max(z1, axis=1, keepdims=True)
    s1 = jnp.sum(jnp.exp(z1 - m1), axis=1, keepdims=True)
    log_p = (z1 - m1) - jnp.log(s1)

    # softmax(z2) and its log, analytically (no elementwise log, no q>0 guard).
    m2 = jnp.max(z2, axis=1, keepdims=True)
    e2 = jnp.exp(z2 - m2)
    s2 = jnp.sum(e2, axis=1, keepdims=True)
    q = e2 * (1.0 / s2)                               # per-row reciprocal only
    log_q = (z2 - m2) - jnp.log(s2)

    tile_sum = jnp.sum(q * (log_q - log_p))

    # Lane-dense (1, 8, 128) partial-sum block; the wrapper reads [:, 0, 0].
    part_ref[...] = jnp.broadcast_to(tile_sum, part_ref.shape).astype(jnp.float32)


def kd_loss(input_logits, target_logits, temp_factor, *, block_n=None):
    """Pallas implementation of KDLoss.forward.

    input_logits  (student) : (N, C) float
    target_logits (teacher) : (N, C) float
    Returns a float32 scalar.
    """
    n, c = input_logits.shape
    assert target_logits.shape == (n, c)

    c_pad = _round_up(c, 128)                     # lane-dense class axis
    if block_n is None:
        block_n = min(_round_up(n, 8), 256)       # rows per tile (VMEM-friendly)
    block_n = _round_up(block_n, 8)
    n_pad = _round_up(n, block_n)
    num_tiles = n_pad // block_n

    def pad(a):
        a = a.astype(jnp.float32)
        return jnp.pad(a, ((0, n_pad - n), (0, c_pad - c)),
                       constant_values=_PAD_NEG)

    x = pad(input_logits)
    t = pad(target_logits)

    kernel = functools.partial(_kd_kernel, inv_temp=float(1.0 / temp_factor))

    cost = pl.CostEstimate(
        flops=10 * n_pad * c_pad,
        transcendentals=2 * n_pad * c_pad + 2 * n_pad,
        bytes_accessed=2 * n_pad * c_pad * 4 + num_tiles * 8 * 128 * 4,
    )

    partials = pl.pallas_call(
        kernel,
        out_shape=jax.ShapeDtypeStruct((num_tiles, 8, 128), jnp.float32),
        grid=(num_tiles,),
        in_specs=[
            pl.BlockSpec((block_n, c_pad), lambda i: (i, 0)),
            pl.BlockSpec((block_n, c_pad), lambda i: (i, 0)),
        ],
        out_specs=pl.BlockSpec((1, 8, 128), lambda i: (i, 0, 0)),
        compiler_params=pltpu.CompilerParams(
            dimension_semantics=("parallel",),
            vmem_limit_bytes=32 * 1024 * 1024,
        ),
        cost_estimate=cost,
    )(x, t)

    total = jnp.sum(partials[:, 0, 0])
    return total * jnp.float32(temp_factor * temp_factor) / jnp.float32(n)


def _reference(input_logits, target_logits, temp_factor):
    # Pure-JAX reference of the PyTorch forward, for sanity checking.
    n = input_logits.shape[0]
    log_p = jax.nn.log_softmax(input_logits / temp_factor, axis=1)
    log_q = jax.nn.log_softmax(target_logits / temp_factor, axis=1)
    q = jnp.exp(log_q)
    kl = jnp.sum(q * (log_q - log_p))
    return kl * (temp_factor ** 2) / n


if __name__ == "__main__":
    temp_factor = 4.0

    # Small shapes consistent with the module: batch of logits over C classes.
    # N=20, C=100, block_n=8 exercises the grid (3 tiles), ragged-row padding
    # (24-row padded batch) and lane padding (C -> 128).
    N, C = 20, 100
    key = jax.random.PRNGKey(0)
    k1, k2 = jax.random.split(key)
    student = jax.random.normal(k1, (N, C), dtype=jnp.float32)
    teacher = jax.random.normal(k2, (N, C), dtype=jnp.float32)

    loss = kd_loss(student, teacher, temp_factor, block_n=8)
    loss = jax.block_until_ready(loss)

    ref = _reference(student, teacher, temp_factor)
    assert jnp.allclose(loss, ref, rtol=1e-5, atol=1e-5), (loss, ref)

    print("KERNEL_OK")
</pallas_src>

<mosaic_0001>
module attributes {stable_mosaic.version = 11 : i64} {
  func.func @_kd_kernel(%arg0: i32, %arg1: memref<8x128xf32, #tpu.memory_space<vmem>>, %arg2: memref<8x128xf32, #tpu.memory_space<vmem>>, %arg3: memref<1x8x128xf32, #tpu.memory_space<vmem>>) attributes {dimension_semantics = [#tpu.dimension_semantics<parallel>], iteration_bounds = array<i64: 3>, scalar_prefetch = 0 : i64, scratch_operands = 0 : i64, tpu.core_type = #tpu.core_type<tc>, window_params = [{transform_indices = @transform_0, window_bounds = array<i64: 8, 128>}, {transform_indices = @transform_1, window_bounds = array<i64: 8, 128>}, {transform_indices = @transform_2, window_bounds = array<i64: 1, 8, 128>}]} {
    %c0 = arith.constant 0 : index
    %c0_0 = arith.constant 0 : index
    %0 = vector.load %arg1[%c0, %c0_0] : memref<8x128xf32, #tpu.memory_space<vmem>>, vector<8x128xf32>
    %cst = arith.constant 2.500000e-01 : f32
    %1 = vector.broadcast %cst : f32 to vector<8x128xf32>
    %2 = arith.mulf %0, %1 : vector<8x128xf32>
    %c0_1 = arith.constant 0 : index
    %c0_2 = arith.constant 0 : index
    %3 = vector.load %arg2[%c0_1, %c0_2] : memref<8x128xf32, #tpu.memory_space<vmem>>, vector<8x128xf32>
    %cst_3 = arith.constant 2.500000e-01 : f32
    %4 = vector.broadcast %cst_3 : f32 to vector<8x128xf32>
    %5 = arith.mulf %3, %4 : vector<8x128xf32>
    %cst_4 = arith.constant dense<0xFF800000> : vector<8xf32>
    %6 = vector.multi_reduction <maximumf>, %2, %cst_4 [1] : vector<8x128xf32> to vector<8xf32>
    %7 = vector.shape_cast %6 : vector<8xf32> to vector<8x1xf32>
    %8 = vector.broadcast %7 : vector<8x1xf32> to vector<8x128xf32>
    %9 = arith.subf %2, %8 : vector<8x128xf32>
    %10 = math.exp %9 : vector<8x128xf32>
    %cst_5 = arith.constant dense<0.000000e+00> : vector<8xf32>
    %11 = vector.multi_reduction <add>, %10, %cst_5 [1] : vector<8x128xf32> to vector<8xf32>
    %12 = vector.shape_cast %11 : vector<8xf32> to vector<8x1xf32>
    %13 = vector.broadcast %7 : vector<8x1xf32> to vector<8x128xf32>
    %14 = arith.subf %2, %13 : vector<8x128xf32>
    %15 = math.log %12 : vector<8x1xf32>
    %16 = vector.broadcast %15 : vector<8x1xf32> to vector<8x128xf32>
    %17 = arith.subf %14, %16 : vector<8x128xf32>
    %cst_6 = arith.constant dense<0xFF800000> : vector<8xf32>
    %18 = vector.multi_reduction <maximumf>, %5, %cst_6 [1] : vector<8x128xf32> to vector<8xf32>
    %19 = vector.shape_cast %18 : vector<8xf32> to vector<8x1xf32>
    %20 = vector.broadcast %19 : vector<8x1xf32> to vector<8x128xf32>
    %21 = arith.subf %5, %20 : vector<8x128xf32>
    %22 = math.exp %21 : vector<8x128xf32>
    %cst_7 = arith.constant dense<0.000000e+00> : vector<8xf32>
    %23 = vector.multi_reduction <add>, %22, %cst_7 [1] : vector<8x128xf32> to vector<8xf32>
    %24 = vector.shape_cast %23 : vector<8xf32> to vector<8x1xf32>
    %cst_8 = arith.constant 1.000000e+00 : f32
    %25 = vector.broadcast %cst_8 : f32 to vector<8x1xf32>
    %26 = arith.divf %25, %24 : vector<8x1xf32>
    %27 = vector.broadcast %26 : vector<8x1xf32> to vector<8x128xf32>
    %28 = arith.mulf %22, %27 : vector<8x128xf32>
    %29 = vector.broadcast %19 : vector<8x1xf32> to vector<8x128xf32>
    %30 = arith.subf %5, %29 : vector<8x128xf32>
    %31 = math.log %24 : vector<8x1xf32>
    %32 = vector.broadcast %31 : vector<8x1xf32> to vector<8x128xf32>
    %33 = arith.subf %30, %32 : vector<8x128xf32>
    %34 = arith.subf %33, %17 : vector<8x128xf32>
    %35 = arith.mulf %28, %34 : vector<8x128xf32>
    %36 = vector.shape_cast %35 : vector<8x128xf32> to vector<1x8x128xf32>
    %cst_9 = arith.constant dense<0.000000e+00> : vector<1xf32>
    %37 = vector.multi_reduction <add>, %36, %cst_9 [1, 2] : vector<1x8x128xf32> to vector<1xf32>
    %38 = vector.shape_cast %37 : vector<1xf32> to vector<1x1x1xf32>
    %39 = vector.extract %38[0, 0, 0] : f32 from vector<1x1x1xf32>
    %40 = vector.broadcast %39 : f32 to vector<1x8x128xf32>
    %c0_10 = arith.constant 0 : index
    %c0_11 = arith.constant 0 : index
    %c0_12 = arith.constant 0 : index
    %41 = vector.load %arg3[%c0_10, %c0_11, %c0_12] : memref<1x8x128xf32, #tpu.memory_space<vmem>>, vector<1x8x128xf32>
    tpu.vector_store %arg3[%c0_10, %c0_11, %c0_12], %40 {strides = array<i32>} : memref<1x8x128xf32, #tpu.memory_space<vmem>>, vector<1x8x128xf32>,
    return
  }
  func.func @transform_0(%arg0: i32) -> (i32, i32) {
    %c0_i32 = arith.constant 0 : i32
    %c0_i32_0 = arith.constant 0 : i32
    return %arg0, %c0_i32 : i32, i32
  }
  func.func @transform_1(%arg0: i32) -> (i32, i32) {
    %c0_i32 = arith.constant 0 : i32
    %c0_i32_0 = arith.constant 0 : i32
    return %arg0, %c0_i32 : i32, i32
  }
  func.func @transform_2(%arg0: i32) -> (i32, i32, i32) {
    %c0_i32 = arith.constant 0 : i32
    %c0_i32_0 = arith.constant 0 : i32
    %c0_i32_1 = arith.constant 0 : i32
    return %arg0, %c0_i32, %c0_i32_0 : i32, i32, i32
  }
}

</mosaic_0001>

<bundles_post_ra>
// kernel: tpu_custom_call.1
= control target key start
LH: loop header
LB: loop body
LE: loop exit
PB: predicated region body
PF: predicated region fallthrough
CT: control target
= control target key end

     0   :  { %7 = vsyncpa [#allocation3], 0  ;;  %s783_s0 = inlined_call_operand.hbm [shape: f32[24,128], index: 0, kind: input, shape index: {}]   ;;  %s784_s1 = inlined_call_operand.hbm [shape: f32[24,128], index: 1, kind: input, shape index: {}]   ;;  %s785_s2 = inlined_call_operand.hbm [shape: f32[3,8,128], index: 2, kind: output, shape index: {}]  }
   0x1   :  { %9 = vsyncpa [#allocation3 + $0x1], 0 }
   0x2   :  { %10 = vsyncpa [#allocation6], 0 }
   0x3   :  { %12 = vsyncpa [#allocation6 + $0x1], 0 }
   0x4   :  { %13 = vsyncpa [#allocation4], 0 }
   0x5   :  { %15 = vsyncpa [#allocation4 + $0x1], 0  ;;  %s571_s9 = smov 0   ;;  %s573_s10 = smov 0  }
   0x6   :  { %s575_s11 = smov 0   ;;  %s577_s12 = smov 0  }
   0x7 LB: > { %s592_s13 = sadd.s32 4294967295, %s551_s12   ;;  %s343_s14 = sadd.s32 4294967294, %s551_s12   ;;  %s551_s12 = sphi %s577_s12, %s803_s12   ;;  %s547_s11 = sphi %s575_s11, %s802_s11   ;;  %s543_s10 = sphi %s573_s10, %s801_s10   ;;  %s539_s9 = sphi %s571_s9, %s800_s9  }
   0x8   : > { %s596_s15 = sadd.s32 1, %s551_s12   ;;  %s28_s16 = sadd.s32 1, %s547_s11 }
   0x9   : > { %s25_s17 = ssub.s32 %s551_s12, %s596_s15  ;;  %p35_p0 = scmp.ne.s32.totalorder %s547_s11, %s543_s10 }
   0xa   : > { %p26_p1 = scmp.eq.s32.totalorder %s25_s17, 0  ;;  %p36_p2 = scmp.eq.s32.totalorder %s551_s12, 0 }
   0xb   : > { %p41_p3 = scmp.ne.s32.totalorder %s543_s10, %s539_s9  ;;  %p42_p4 = scmp.eq.s32.totalorder %s592_s13, 0 }
   0xc   : > { %s608_s18 = scalar_select %p26_p1, %s547_s11, %s28_s16  }
   0xd   : > { %p610_p5 = por %p36_p2, %p35_p0  ;;  %p614_p6 = por %p42_p4, %p41_p3 }
   0xe   : > { %p91_p7 = scmp.eq.s32.totalorder %s592_s13, 2  ;;  %p97_p8 = scmp.eq.s32.totalorder %s343_s14, 2 }
   0xf   : > { %s789_s20 = scalar_select %p614_p6, 1, 0 }
  0x10   : > { %p377_p9 = scmp.lt.s32.totalorder %s551_s12, 3  ;;  %p620_p10 = por %p91_p7, %p35_p0 }
  0x11   : > { %p624_p11 = por %p97_p8, %p41_p3  ;;  %s629_s23 = sand.u32 1, %s547_s11  }
  0x12   : > { %s790_s21 = scalar_select %p620_p10, 1, 0 }
  0x13   : > { %s791_s22 = scalar_select %p624_p11, 1, 0 }
  0x14   : > { %s347_s24 = sshll.u32 %s551_s12, 7  ;;  %s346_s25 = sshll.u32 %s629_s23, 3 }
  0x15   : > { %s638_s28 = scalar_lea.hbm %s783_s0, %s347_s24  ;;  %s121_s29 = scalar_lea.vmem [#allocation2], %s346_s25 }
  0x16   : > { %s128_s30 = sshll.u32 %s121_s29, 4  ;;  %p644_p12 = pnand %p377_p9, %p610_p5  ;;  %s648_s30 = int_to_ptr.vmem [resolvable:$true] %s128_s30 }
  0x17   : > { %s118_s4 = scalar_lea.sflag [#allocation3], %s629_s23  ;;  %s421_s5 = scalar_lea.hbm %s638_s28, 128 }
  0x18   : > { %p422_p1 = scmp.ne.s32.totalorder %s638_s28, %s421_s5  ;;  %p423_p2 = pneg %p644_p12 }
  0x19   : > { %s426_s8 = scalar_lea.hbm %s783_s0, 384  ;;  %p427_p5 = scmp.lt.u32.totalorder %s638_s28, %s783_s0 }
  0x1a   : > { %p424_p3 = pnand %p423_p2, %p422_p1  ;;  %p428_p7 = scmp.lt.u32.totalorder %s426_s8, %s421_s5 }
  0x1b   : > { %p430_p9 = scmp.lt.u32.totalorder %s421_s5, %s638_s28 }
  0x1c   : > { %p425_p4 = pneg %p424_p3  ;;  %p429_p8 = por %p428_p7, %p427_p5 }
  0x1e   : > { %p431_p13 = por %p430_p9, %p429_p8 }
  0x20   : > { %p432_p0 = pnand %p431_p13, %p425_p4 }
  0x22   : > { %435 = shalt.err (!%p432_p0)
}
  0x23   : > { %s436_s17 = scalar_lea.vmem %s648_s30, 128  ;;  %s553_s19 = smov [#allocation2]  }
  0x24   : > { %p437_p1 = scmp.ne.s32.totalorder %s648_s30, %s436_s17  ;;  %s441_s26 = sshll.u32 %s553_s19, 4  ;;  %s442_s26 = int_to_ptr.vmem [resolvable:$false] %s441_s26 }
  0x25   : > { %s443_s27 = scalar_lea.vmem %s442_s26, 256  ;;  %p444_p10 = scmp.lt.s32.totalorder %s648_s30, %s442_s26 }
  0x26   : > { %p439_p3 = pnand %p437_p1, %p423_p2  ;;  %p445_p5 = scmp.lt.s32.totalorder %s443_s27, %s436_s17 }
  0x28   : > { %p440_p11 = pneg %p439_p3  ;;  %p446_p7 = por %p445_p5, %p444_p10 }
  0x2a   : > { %p447_p8 = pnand %p446_p7, %p440_p11 }
  0x2c   : > { %450 = shalt.err (!%p447_p8)
}
  0x2d   : > { %369 = dma.hbm_to_vmem [thread:$0]  (!%p644_p12), %s638_s28, 128, %s648_s30, %s118_s4  }
  0x2e   : > { %p793_p13 = scmp.lt.s32.totalorder %s551_s12, 4  ;;  %p794_p0 = scmp.ge.s32.totalorder %s551_s12, 1 }
  0x2f   : > { %s691_s7 = scalar_lea.hbm %s784_s1, %s347_s24  ;;  %s139_s8 = scalar_lea.vmem [#allocation5], %s346_s25 }
  0x30   : > { %p682_p4 = pnand %p794_p0, %p793_p13  ;;  %s146_s14 = sshll.u32 %s139_s8, 4  ;;  %s147_s14 = int_to_ptr.vmem [resolvable:$true] %s146_s14 }
  0x31   : > { %s136_s28 = scalar_lea.sflag [#allocation6], %s629_s23  ;;  %s451_s30 = scalar_lea.hbm %s691_s7, 128 }
  0x32   : > { %s795_s29 = scalar_select %p682_p4, 1, 0 }
  0x33   : > { %p452_p10 = scmp.ne.s32.totalorder %s691_s7, %s451_s30  ;;  %s456_s24 = scalar_lea.hbm %s784_s1, 384 }
  0x34   : > { %p457_p1 = scmp.lt.u32.totalorder %s691_s7, %s784_s1  ;;  %p458_p3 = scmp.lt.u32.totalorder %s456_s24, %s451_s30 }
  0x35   : > { %p454_p11 = pnand %p452_p10, %p423_p2  ;;  %p460_p7 = scmp.lt.u32.totalorder %s451_s30, %s691_s7 }
  0x36   : > { %p459_p5 = por %p458_p3, %p457_p1 }
  0x37   : > { %p455_p9 = pneg %p454_p11 }
  0x38   : > { %p461_p8 = por %p460_p7, %p459_p5 }
  0x3a   : > { %p462_p13 = pnand %p461_p8, %p455_p9 }
  0x3c   : > { %465 = shalt.err (!%p462_p13)
}
  0x3d   : > { %s466_s23 = scalar_lea.vmem %s147_s14, 128  ;;  %s554_s25 = smov [#allocation5]  }
  0x3e   : > { %p467_p0 = scmp.ne.s32.totalorder %s147_s14, %s466_s23  ;;  %s471_s26 = sshll.u32 %s554_s25, 4  ;;  %s472_s26 = int_to_ptr.vmem [resolvable:$false] %s471_s26 }
  0x3f   : > { %s473_s27 = scalar_lea.vmem %s472_s26, 256  ;;  %p474_p6 = scmp.lt.s32.totalorder %s147_s14, %s472_s26 }
  0x40   : > { %p469_p10 = pnand %p467_p0, %p423_p2  ;;  %p475_p4 = scmp.lt.s32.totalorder %s473_s27, %s466_s23 }
  0x42   : > { %p470_p11 = pneg %p469_p10  ;;  %p476_p1 = por %p475_p4, %p474_p6 }
  0x44   : > { %p477_p3 = pnand %p476_p1, %p470_p11 }
  0x46   : > { %480 = shalt.err (!%p477_p3)
}
  0x47   : > { %372 = dma.hbm_to_vmem [thread:$0]  (!%p644_p12), %s691_s7, 128, %s147_s14, %s136_s28  }
  0x48   : > { %p796_p9 = scmp.ne.s32.totalorder %s795_s29, 0 }
  0x49   : > { %s718_s5 = sand.u32 (!%p796_p9), 1, %s543_s10   ;;  %p797_p6 = scmp.ne.s32.totalorder (!%p796_p9), %s789_s20, 0 }
  0x4a   : > { %155 = sbr.rel (%p796_p9) target bundleno = 628 (0x274), region = 28  ;;  %s721_s6 = sshll.u32 (!%p796_p9), %s718_s5, 3 }
  0x4b   : > { %s158_s8 = scalar_lea.sflag (!%p796_p9), [#allocation3], %s718_s5  ;;  %s161_s30 = scalar_lea.vmem (!%p796_p9), [#allocation2], %s721_s6 }
  0x51   : > { %526 = dma.done.wait (%p797_p6), %s158_s8, 128  }
  0x52   : > { %528 = vsyncadd (%p797_p6), %s158_s8, 4294967168  ;;  %s167_s3 = scalar_lea.sflag [#allocation6], %s718_s5  ;;  %s170_s29 = scalar_lea.vmem [#allocation5], %s721_s6 }
  0x53   : > { %530 = dma.done.wait (%p797_p6), %s167_s3, 128  }
  0x54   : > { %532 = vsyncadd (%p797_p6), %s167_s3, 4294967168  ;;  %v196_v0 = vld [vmem:[%s161_s30] sm:$0xff]  ;;  %v198_v1 = vld [vmem:[%s170_s29] sm:$0xff]  ;;  %s195_s20 = scalar_lea.vmem [#allocation7], %s721_s6  ;;  %s355_s14 = sshll.u32 %s592_s13, 7 }
  0x55   : > { %v197_v2 = vmul.f32 0.25, %v196_v0  ;;  %v199_v3 = vmul.f32 0.25, %v198_v1  ;;  %s250_s7 = sshll.u32 %s195_s20, 4  ;;  %s742_s24 = scalar_lea.hbm %s785_s2, %s355_s14  ;;  %s737_s7 = int_to_ptr.vmem [resolvable:$true] %s250_s7 }
  0x56   : > { %s237_s17 = scalar_lea.sflag [#allocation4], %s718_s5  ;;  %s481_s19 = scalar_lea.vmem %s737_s7, 128 }
  0x57   : > { %200 = vmax.xlane.f32.xlu0 %v197_v2  ;;  %p482_p12 = scmp.ne.s32.totalorder %s737_s7, %s481_s19  ;;  %p798_p2 = scmp.ne.s32.totalorder %s790_s21, 0 }
  0x58   : > { %s555_s13 = smov [#allocation7]  }
  0x59   : > { %p483_p4 = pnand %p482_p12, %p798_p2  ;;  %s485_s23 = sshll.u32 %s555_s13, 4  ;;  %s486_s23 = int_to_ptr.vmem [resolvable:$false] %s485_s23 }
  0x5a   : > { %s487_s25 = scalar_lea.vmem %s486_s23, 256  ;;  %p488_p7 = scmp.lt.s32.totalorder %s737_s7, %s486_s23 }
  0x5b   : > { %210 = vmax.xlane.f32.xlu0 %v199_v3  ;;  %p484_p5 = pneg %p483_p4  ;;  %p489_p8 = scmp.lt.s32.totalorder %s487_s25, %s481_s19 }
  0x5d   : > { %p490_p13 = por %p489_p8, %p488_p7 }
  0x5f   : > { %p491_p0 = pnand %p490_p13, %p484_p5 }
  0xe4   : > { %v201_v4 = vpop.xlane.xlu0 %200 }
  0xe5   : > { %v202_v5 = vsub.f32 %v197_v2, %v201_v4 }
  0xe7   : > { %v203_v6 = vmul.f32 1.442695, %v202_v5 }
  0xe8   : > { %v211_v7 = vpop.xlane.xlu0 %210 }
  0xe9   : > { %v212_v8 = vsub.f32 %v199_v3, %v211_v7  ;;  %411 = vpow2.f32 %v203_v6 }
  0xeb   : > { %v213_v9 = vmul.f32 1.442695, %v212_v8 }
  0xed   : > { %413 = vpow2.f32 %v213_v9 }
  0xf3   : > { %v412_v10 = vpop.eup %411 }
  0xf4   : > { %205 = vadd.xlane.f32.xlu1 %v412_v10 }
  0xf7   : > { %v414_v11 = vpop.eup %413 }
  0xf8   : > { %215 = vadd.xlane.f32.xlu1 %v414_v11 }
 0x181   : > { %v206_v12 = vpop.xlane.xlu1 %205 }
 0x182   : > { %415 = vlog2.f32 %v206_v12 }
 0x185   : > { %v216_v13 = vpop.xlane.xlu1 %215 }
 0x186   : > { %417 = vlog2.f32 %v216_v13 }
 0x187   : > { %419 = vrcp.f32 %v216_v13 }
 0x18c   : > { %v416_v14 = vpop.eup %415 }
 0x18d   : > { %v208_v15 = vmul.f32 0.6931472, %v416_v14 }
 0x18f   : > { %v209_v19 = vsub.f32 %v202_v5, %v208_v15 }
 0x190   : > { %v418_v16 = vpop.eup %417 }
 0x191   : > { %v221_v17 = vmul.f32 0.6931472, %v418_v16  ;;  %v420_v18 = vpop.eup %419 }
 0x192   : > { %v219_v21 = vmul.f32 %v420_v18, %v414_v11 }
 0x193   : > { %v222_v20 = vsub.f32 %v212_v8, %v221_v17 }
 0x195   : > { %v223_v22 = vsub.f32 %v222_v20, %v209_v19 }
 0x197   : > { %v224_v23 = vmul.f32 %v223_v22, %v219_v21 }
 0x199   : > { %225 = vadd.xlane.f32.xlu0 %v224_v23 }
 0x226   : > { %v226_v24 = vpop.xlane.xlu0 %225 }
 0x227   : > { %v227_v25 = vrot.slane %v226_v24, 4 }
 0x229   : > { %v228_v26 = vadd.f32 %v227_v25, %v226_v24 }
 0x22b   : > { %v229_v27 = vrot.slane %v228_v26, 2 }
 0x22d   : > { %v230_v28 = vadd.f32 %v229_v27, %v228_v26 }
 0x22f   : > { %v231_v29 = vrot.slane %v230_v28, 1 }
 0x231   : > { %v232_v30 = vadd.f32 %v231_v29, %v230_v28 }
 0x233   : > { %358 = vpush %v232_v30 }
 0x264   : > { %s359_s28 = spop %358 }
 0x265   : > { %v234_v31 = vstv %s359_s28 }
 0x266   : > { %235 = vst [vmem:[%s195_s20] sm:$0xff] %v234_v31 }
 0x267   : > { %494 = shalt.err (!%p491_p0)
}
 0x268   : > { %s495_s26 = scalar_lea.hbm %s742_s24, 128  ;;  %s499_s6 = scalar_lea.hbm %s785_s2, 384 }
 0x269   : > { %p496_p10 = scmp.ne.s32.totalorder %s742_s24, %s495_s26  ;;  %p500_p3 = scmp.lt.u32.totalorder %s742_s24, %s785_s2 }
 0x26a   : > { %p501_p9 = scmp.lt.u32.totalorder %s499_s6, %s495_s26  ;;  %p503_p12 = scmp.lt.u32.totalorder %s495_s26, %s742_s24 }
 0x26b   : > { %p497_p11 = pnand %p496_p10, %p798_p2 }
 0x26c   : > { %p502_p6 = por %p501_p9, %p500_p3 }
 0x26d   : > { %p498_p1 = pneg %p497_p11 }
 0x26e   : > { %p504_p4 = por %p503_p12, %p502_p6 }
 0x270   : > { %p505_p5 = pnand %p504_p4, %p498_p1 }
 0x272   : > { %508 = shalt.err (!%p505_p5)
}
 0x273   : > { %364 = dma.vmem_to_hbm [thread:$0]  (%p798_p2), %s737_s7, 128, %s742_s24, %s237_s17  }
 0x274 PF: > { %p378_p7 = scmp.ge.s32.totalorder %s551_s12, 2  ;;  %s262_s3 = sand.u32 1, %s539_s9  }
 0x275   : > { %p799_p8 = scmp.ne.s32.totalorder %s791_s22, 0  ;;  %s263_s29 = scalar_lea.sflag [#allocation4], %s262_s3 }
 0x277   : > { %p374_p13 = pnand %p378_p7, %p799_p8 }
 0x279   : > { %534 = dma.done.wait (!%p374_p13), %s263_s29, 128  }
 0x27a   : > { %536 = vsyncadd (!%p374_p13), %s263_s29, 4294967168  ;;  %p18_p0 = scmp.ge.s32.totalorder %s596_s15, 5   ;;  %s800_s9 = smov %s543_s10 }
 0x27b   : > { %s801_s10 = smov %s547_s11  ;;  %s802_s11 = smov %s608_s18 }
 0x27c   : > { %s803_s12 = smov %s596_s15  ;;  %20 = sbr.rel (!%p18_p0) target bundleno = 7 (0x7), region = 86 }
 0x283   :  { %268 = vsyncpa [#allocation3], 1 }
 0x284   :  { %270 = vsyncpa [#allocation3 + $0x1], 1 }
 0x285   :  { %271 = vsyncpa [#allocation6], 1 }
 0x286   :  { %273 = vsyncpa [#allocation6 + $0x1], 1 }
 0x287   :  { %274 = vsyncpa [#allocation4], 1 }
 0x288   :  { %276 = vsyncpa [#allocation4 + $0x1], 1 }

</bundles_post_ra>
